<compile_context>
chip_gen: v7x
topology: tpu7x:2x2x1
jax: 0.10.0
libtpu: 0.0.40
codegen_flags: <defaults>
</compile_context>

<pallas_src>
import functools

import jax
import jax.numpy as jnp
from jax import lax
from jax.experimental import pallas as pl
from jax.experimental.pallas import tpu as pltpu

N_EMBED = 32
_LANE = 128   # lane tile (last dim)
_SUB = 8      # f32 sublane tile (second-minor dim)
_NEG = jnp.float32(-1e30)  # finite sentinel for padded vocab columns (NOT -inf)


def _round_up(x, m):
    return ((x + m - 1) // m) * m


def _row_tiling(n):
    """(tile_n, n_pad) for the row (B*T) grid axis."""
    tile_n = min(256, _round_up(n, _SUB))
    n_pad = _round_up(n, tile_n)
    return tile_n, n_pad


# ---------------------------------------------------------------------------
# Kernels
# ---------------------------------------------------------------------------
def _bigram_loss_kernel(idx_sref, tgt_sref,            # SMEM scalar-prefetch ids
                        emb_ref, w_t_ref, w_v_ref,     # VMEM parameter inputs
                        logits_ref, nll_ref,           # VMEM outputs
                        tok_scr, wtg_scr):             # VMEM scratch
    """Per row-tile: gather embeddings, matmul to logits, per-row cross-entropy.

    idx_sref / tgt_sref : (n_pad,) int32 in SMEM.
    emb_ref : (v_pad, e_aug) f32, row v = [emb[v], 1, 0...]   (bias feature).
    w_t_ref : (e_aug, v_pad) f32, col v = [W[v], b[v], 0...]; padded vocab
              columns carry a -1e30 bias so they vanish from max / logsumexp.
    w_v_ref : (v_pad, e_aug) f32, row v = [W[v], b[v], 0...]  (target gather).
    logits_ref : (tile_n, v_pad) f32 out.
    nll_ref    : (tile_n, 1)     f32 out -- per-row cross entropy.
    """
    tile_n = logits_ref.shape[0]
    base = pl.program_id(0) * tile_n

    def gather(i, carry):
        r = idx_sref[base + i]
        t = tgt_sref[base + i]
        tok_scr[pl.ds(i, 1), :] = emb_ref[pl.ds(r, 1), :]
        wtg_scr[pl.ds(i, 1), :] = w_v_ref[pl.ds(t, 1), :]
        return carry

    lax.fori_loop(0, tile_n, gather, 0, unroll=tile_n <= 64)

    tok = tok_scr[...]                                           # (tile_n, e_aug)
    logits = jnp.dot(tok, w_t_ref[...],
                     preferred_element_type=jnp.float32)         # (tile_n, v_pad)
    logits_ref[...] = logits

    # Cross entropy per row (matches F.cross_entropy before the mean).
    m = jnp.max(logits, axis=-1, keepdims=True)
    lse = m + jnp.log(jnp.sum(jnp.exp(logits - m), axis=-1, keepdims=True))
    tgt_logit = jnp.sum(tok * wtg_scr[...], axis=-1, keepdims=True)
    nll_ref[...] = lse - tgt_logit


def _bigram_logits_kernel(idx_sref, table_ref, logits_ref):
    """Generation path: logits[i, :] = table[idx[i], :] -- pure row gather."""
    tile_n = logits_ref.shape[0]
    base = pl.program_id(0) * tile_n

    def gather(i, carry):
        r = idx_sref[base + i]
        logits_ref[pl.ds(i, 1), :] = table_ref[pl.ds(r, 1), :]
        return carry

    lax.fori_loop(0, tile_n, gather, 0, unroll=tile_n <= 64)


# ---------------------------------------------------------------------------
# Wrappers
# ---------------------------------------------------------------------------
@jax.jit
def _forward_with_loss(idx, targets, emb_table, lm_w, lm_b):
    b, t = idx.shape
    v, e = emb_table.shape
    n = b * t
    v_pad = _round_up(max(v, _LANE), _LANE)
    e_aug = _round_up(e + 1, _LANE)          # embedding dim + bias feature, padded
    tile_n, n_pad = _row_tiling(n)
    grid = (n_pad // tile_n,)

    # O(V*E) padded / augmented parameter tensors (no (V, V) intermediate).
    emb_aug = jnp.zeros((v_pad, e_aug), jnp.float32)
    emb_aug = emb_aug.at[:v, :e].set(emb_table.astype(jnp.float32))
    emb_aug = emb_aug.at[:v, e].set(1.0)                         # bias feature

    w_v_aug = jnp.zeros((v_pad, e_aug), jnp.float32)
    w_v_aug = w_v_aug.at[:v, :e].set(lm_w.astype(jnp.float32))
    w_v_aug = w_v_aug.at[:v, e].set(lm_b.astype(jnp.float32))

    w_t_aug = w_v_aug.T                                          # (e_aug, v_pad)
    w_t_aug = w_t_aug.at[e, v:].set(_NEG)                        # kill padded cols

    idx_flat = jnp.pad(idx.reshape(n).astype(jnp.int32), (0, n_pad - n))
    tgt_flat = jnp.pad(targets.reshape(n).astype(jnp.int32), (0, n_pad - n))

    def full_spec(shape):
        # Constant index_map -> block stays VMEM-resident across grid steps.
        return pl.BlockSpec(shape, lambda i, *_: (0, 0))

    logits_pad, nll = pl.pallas_call(
        _bigram_loss_kernel,
        grid_spec=pltpu.PrefetchScalarGridSpec(
            num_scalar_prefetch=2,
            grid=grid,
            in_specs=[full_spec((v_pad, e_aug)),
                      full_spec((e_aug, v_pad)),
                      full_spec((v_pad, e_aug))],
            out_specs=[pl.BlockSpec((tile_n, v_pad), lambda i, *_: (i, 0)),
                       pl.BlockSpec((tile_n, 1), lambda i, *_: (i, 0))],
            scratch_shapes=[pltpu.VMEM((tile_n, e_aug), jnp.float32),
                            pltpu.VMEM((tile_n, e_aug), jnp.float32)],
        ),
        out_shape=(jax.ShapeDtypeStruct((n_pad, v_pad), jnp.float32),
                   jax.ShapeDtypeStruct((n_pad, 1), jnp.float32)),
        compiler_params=pltpu.CompilerParams(
            dimension_semantics=("parallel",)),
    )(idx_flat, tgt_flat, emb_aug, w_t_aug, w_v_aug)

    logits = logits_pad[:n, :v]
    loss = jnp.mean(nll[:n, 0])
    return logits, loss


@jax.jit
def precompute_logits_table(params):
    """Fused logits table  M = emb @ W^T + b, padded to (v_pad, v_pad).

    Parameter-only work: build ONCE per parameter set and reuse it for every
    generation step.  Padded columns hold a FINITE -1e30 so max / softmax over
    a padded row stays well behaved; padded rows are never gathered (ids < V).
    """
    emb_table, lm_w, lm_b = params
    v, _ = emb_table.shape
    v_pad = _round_up(max(v, _LANE), _LANE)
    table = jnp.dot(emb_table.astype(jnp.float32),
                    lm_w.astype(jnp.float32).T,
                    precision=lax.Precision.HIGHEST)
    table = table + lm_b.astype(jnp.float32)[None, :]
    table = jnp.pad(table, ((0, v_pad - v), (0, v_pad - v)))
    col_is_real = (jnp.arange(v_pad) < v)[None, :]
    return jnp.where(col_is_real, table, _NEG)


@functools.partial(jax.jit, static_argnums=(2,))
def _forward_logits_from_table(idx, table, v):
    b, t = idx.shape
    v_pad = table.shape[0]
    n = b * t
    tile_n, n_pad = _row_tiling(n)

    idx_flat = jnp.pad(idx.reshape(n).astype(jnp.int32), (0, n_pad - n))

    logits_pad = pl.pallas_call(
        _bigram_logits_kernel,
        grid_spec=pltpu.PrefetchScalarGridSpec(
            num_scalar_prefetch=1,
            grid=(n_pad // tile_n,),
            in_specs=[pl.BlockSpec((v_pad, v_pad), lambda i, *_: (0, 0))],
            out_specs=pl.BlockSpec((tile_n, v_pad), lambda i, *_: (i, 0)),
        ),
        out_shape=jax.ShapeDtypeStruct((n_pad, v_pad), jnp.float32),
        compiler_params=pltpu.CompilerParams(
            dimension_semantics=("parallel",)),
    )(idx_flat, table)
    return logits_pad[:n, :v].reshape(b, t, v)


def bigram_forward(idx, params, targets=None, logits_table=None):
    """Mirrors BigramLanguageModel.forward.

    With targets: returns (logits of shape (B*T, V), mean cross-entropy loss)
    -- the PyTorch module re-views logits before the loss.
    Without targets: returns (logits of shape (B, T, V), None).  Pass a cached
    `logits_table` (from precompute_logits_table) in a decode loop so the fused
    table is not rebuilt per step.
    """
    emb_table, lm_w, lm_b = params
    v = emb_table.shape[0]
    if targets is None:
        if logits_table is None:
            logits_table = precompute_logits_table(params)
        return _forward_logits_from_table(idx, logits_table, v), None
    return _forward_with_loss(idx, targets, emb_table, lm_w, lm_b)


def bigram_generate(idx, params, max_new_tokens, key):
    """Equivalent of BigramLanguageModel.generate (multinomial -> categorical)."""
    table = precompute_logits_table(params)      # built once, reused per step
    v = params[0].shape[0]
    for _ in range(max_new_tokens):
        logits = _forward_logits_from_table(idx, table, v)       # (B, T, V)
        key, sub = jax.random.split(key)
        nxt = jax.random.categorical(sub, logits[:, -1, :], axis=-1)
        idx = jnp.concatenate([idx, nxt[:, None].astype(idx.dtype)], axis=1)
    return idx


def init_params(key, vocab_size, n_embed=N_EMBED):
    """Deterministic synthetic parameters (shapes per nn.Embedding/nn.Linear)."""
    k1, k2, k3 = jax.random.split(key, 3)
    emb_table = jax.random.normal(k1, (vocab_size, n_embed), jnp.float32)
    bound = 1.0 / jnp.sqrt(n_embed)
    lm_w = jax.random.uniform(k2, (vocab_size, n_embed), jnp.float32,
                              -bound, bound)
    lm_b = jax.random.uniform(k3, (vocab_size,), jnp.float32, -bound, bound)
    return emb_table, lm_w, lm_b


if __name__ == "__main__":
    VOCAB = 64
    B, T = 2, 8

    key = jax.random.PRNGKey(0)
    k_params, k_idx, k_tgt, k_gen = jax.random.split(key, 4)

    params = init_params(k_params, VOCAB)
    idx = jax.random.randint(k_idx, (B, T), 0, VOCAB, dtype=jnp.int32)
    targets = jax.random.randint(k_tgt, (B, T), 0, VOCAB, dtype=jnp.int32)

    # Training path: (logits (B*T, V), loss).
    logits, loss = bigram_forward(idx, params, targets)
    jax.block_until_ready((logits, loss))
    assert logits.shape == (B * T, VOCAB)

    # Generation path with a CACHED fused table (perf feedback #1): the table is
    # built once and reused; each forward is a single gather-kernel dispatch.
    table = precompute_logits_table(params)
    logits_gen, loss_none = bigram_forward(idx, params, None, logits_table=table)
    logits_gen2, _ = bigram_forward(idx, params, None, logits_table=table)
    jax.block_until_ready((logits_gen, logits_gen2))
    assert loss_none is None
    assert logits_gen.shape == (B, T, VOCAB)

    # Tiny sampling loop (like .generate), reusing the cached table per step.
    gen = bigram_generate(idx, params, 2, k_gen)
    jax.block_until_ready(gen)
    assert gen.shape == (B, T + 2)
    assert bool(jnp.all((gen >= 0) & (gen < VOCAB)))

    # Pure-JAX reference (HIGHEST precision matmul).
    emb_table, lm_w, lm_b = params
    tok_emb = jnp.take(emb_table, idx, axis=0)                       # (B, T, E)
    ref_logits = jnp.einsum("bte,ve->btv", tok_emb, lm_w,
                            precision=lax.Precision.HIGHEST) + lm_b
    ref_lse = jax.scipy.special.logsumexp(ref_logits, axis=-1)
    ref_tgt_logit = jnp.take_along_axis(ref_logits, targets[..., None],
                                        axis=-1)[..., 0]
    ref_loss = jnp.mean(ref_lse - ref_tgt_logit)

    assert jnp.allclose(logits, ref_logits.reshape(B * T, VOCAB),
                        atol=5e-3, rtol=5e-3)
    assert jnp.allclose(logits_gen, ref_logits, atol=5e-3, rtol=5e-3)
    assert jnp.allclose(logits_gen, logits_gen2)
    assert jnp.allclose(loss, ref_loss, atol=5e-3, rtol=5e-3)

    print("KERNEL_OK")
</pallas_src>

<mosaic_0001>
module attributes {stable_mosaic.version = 11 : i64} {
  func.func @_bigram_loss_kernel(%arg0: i32, %arg1: memref<16xi32, #tpu.memory_space<smem>>, %arg2: memref<16xi32, #tpu.memory_space<smem>>, %arg3: memref<128x128xf32, #tpu.memory_space<vmem>>, %arg4: memref<128x128xf32, #tpu.memory_space<vmem>>, %arg5: memref<128x128xf32, #tpu.memory_space<vmem>>, %arg6: memref<16x128xf32, #tpu.memory_space<vmem>>, %arg7: memref<16x1xf32, #tpu.memory_space<vmem>>, %arg8: memref<16x128xf32, #tpu.memory_space<vmem>>, %arg9: memref<16x128xf32, #tpu.memory_space<vmem>>) attributes {dimension_semantics = [#tpu.dimension_semantics<parallel>], iteration_bounds = array<i64: 1>, scalar_prefetch = 2 : i64, scratch_operands = 2 : i64, tpu.core_type = #tpu.core_type<tc>, window_params = [{pipeline_mode = #tpu.pipeline_mode<synchronous>, transform_indices = @transform_0, window_bounds = array<i64: 128, 128>}, {pipeline_mode = #tpu.pipeline_mode<synchronous>, transform_indices = @transform_1, window_bounds = array<i64: 128, 128>}, {pipeline_mode = #tpu.pipeline_mode<synchronous>, transform_indices = @transform_2, window_bounds = array<i64: 128, 128>}, {transform_indices = @transform_3, window_bounds = array<i64: 16, 128>}, {transform_indices = @transform_4, window_bounds = array<i64: 16, 1>}]} {
    %c16_i32 = arith.constant 16 : i32
    %0 = arith.muli %arg0, %c16_i32 : i32
    %c0_i32 = arith.constant 0 : i32
    %1 = arith.addi %0, %c0_i32 : i32
    %2 = arith.index_cast %1 : i32 to index
    %3 = memref.load %arg1[%2] : memref<16xi32, #tpu.memory_space<smem>>
    %4 = arith.addi %0, %c0_i32 : i32
    %5 = arith.index_cast %4 : i32 to index
    %6 = memref.load %arg2[%5] : memref<16xi32, #tpu.memory_space<smem>>
    %7 = arith.index_cast %3 : i32 to index
    %c0 = arith.constant 0 : index
    %8 = vector.load %arg3[%7, %c0] : memref<128x128xf32, #tpu.memory_space<vmem>>, vector<1x128xf32>
    %9 = arith.index_cast %c0_i32 : i32 to index
    %c0_0 = arith.constant 0 : index
    %10 = vector.load %arg8[%9, %c0_0] : memref<16x128xf32, #tpu.memory_space<vmem>>, vector<1x128xf32>
    tpu.vector_store %arg8[%9, %c0_0], %8 {strides = array<i32>} : memref<16x128xf32, #tpu.memory_space<vmem>>, vector<1x128xf32>,
    %11 = arith.index_cast %6 : i32 to index
    %c0_1 = arith.constant 0 : index
    %12 = vector.load %arg5[%11, %c0_1] : memref<128x128xf32, #tpu.memory_space<vmem>>, vector<1x128xf32>
    %13 = arith.index_cast %c0_i32 : i32 to index
    %c0_2 = arith.constant 0 : index
    %14 = vector.load %arg9[%13, %c0_2] : memref<16x128xf32, #tpu.memory_space<vmem>>, vector<1x128xf32>
    tpu.vector_store %arg9[%13, %c0_2], %12 {strides = array<i32>} : memref<16x128xf32, #tpu.memory_space<vmem>>, vector<1x128xf32>,
    %c1_i32 = arith.constant 1 : i32
    %15 = arith.addi %0, %c1_i32 : i32
    %16 = arith.index_cast %15 : i32 to index
    %17 = memref.load %arg1[%16] : memref<16xi32, #tpu.memory_space<smem>>
    %18 = arith.addi %0, %c1_i32 : i32
    %19 = arith.index_cast %18 : i32 to index
    %20 = memref.load %arg2[%19] : memref<16xi32, #tpu.memory_space<smem>>
    %21 = arith.index_cast %17 : i32 to index
    %c0_3 = arith.constant 0 : index
    %22 = vector.load %arg3[%21, %c0_3] : memref<128x128xf32, #tpu.memory_space<vmem>>, vector<1x128xf32>
    %23 = arith.index_cast %c1_i32 : i32 to index
    %c0_4 = arith.constant 0 : index
    %24 = vector.load %arg8[%23, %c0_4] : memref<16x128xf32, #tpu.memory_space<vmem>>, vector<1x128xf32>
    tpu.vector_store %arg8[%23, %c0_4], %22 {strides = array<i32>} : memref<16x128xf32, #tpu.memory_space<vmem>>, vector<1x128xf32>,
    %25 = arith.index_cast %20 : i32 to index
    %c0_5 = arith.constant 0 : index
    %26 = vector.load %arg5[%25, %c0_5] : memref<128x128xf32, #tpu.memory_space<vmem>>, vector<1x128xf32>
    %27 = arith.index_cast %c1_i32 : i32 to index
    %c0_6 = arith.constant 0 : index
    %28 = vector.load %arg9[%27, %c0_6] : memref<16x128xf32, #tpu.memory_space<vmem>>, vector<1x128xf32>
    tpu.vector_store %arg9[%27, %c0_6], %26 {strides = array<i32>} : memref<16x128xf32, #tpu.memory_space<vmem>>, vector<1x128xf32>,
    %c2_i32 = arith.constant 2 : i32
    %29 = arith.addi %0, %c2_i32 : i32
    %30 = arith.index_cast %29 : i32 to index
    %31 = memref.load %arg1[%30] : memref<16xi32, #tpu.memory_space<smem>>
    %32 = arith.addi %0, %c2_i32 : i32
    %33 = arith.index_cast %32 : i32 to index
    %34 = memref.load %arg2[%33] : memref<16xi32, #tpu.memory_space<smem>>
    %35 = arith.index_cast %31 : i32 to index
    %c0_7 = arith.constant 0 : index
    %36 = vector.load %arg3[%35, %c0_7] : memref<128x128xf32, #tpu.memory_space<vmem>>, vector<1x128xf32>
    %37 = arith.index_cast %c2_i32 : i32 to index
    %c0_8 = arith.constant 0 : index
    %38 = vector.load %arg8[%37, %c0_8] : memref<16x128xf32, #tpu.memory_space<vmem>>, vector<1x128xf32>
    tpu.vector_store %arg8[%37, %c0_8], %36 {strides = array<i32>} : memref<16x128xf32, #tpu.memory_space<vmem>>, vector<1x128xf32>,
    %39 = arith.index_cast %34 : i32 to index
    %c0_9 = arith.constant 0 : index
    %40 = vector.load %arg5[%39, %c0_9] : memref<128x128xf32, #tpu.memory_space<vmem>>, vector<1x128xf32>
    %41 = arith.index_cast %c2_i32 : i32 to index
    %c0_10 = arith.constant 0 : index
    %42 = vector.load %arg9[%41, %c0_10] : memref<16x128xf32, #tpu.memory_space<vmem>>, vector<1x128xf32>
    tpu.vector_store %arg9[%41, %c0_10], %40 {strides = array<i32>} : memref<16x128xf32, #tpu.memory_space<vmem>>, vector<1x128xf32>,
    %c3_i32 = arith.constant 3 : i32
    %43 = arith.addi %0, %c3_i32 : i32
    %44 = arith.index_cast %43 : i32 to index
    %45 = memref.load %arg1[%44] : memref<16xi32, #tpu.memory_space<smem>>
    %46 = arith.addi %0, %c3_i32 : i32
    %47 = arith.index_cast %46 : i32 to index
    %48 = memref.load %arg2[%47] : memref<16xi32, #tpu.memory_space<smem>>
    %49 = arith.index_cast %45 : i32 to index
    %c0_11 = arith.constant 0 : index
    %50 = vector.load %arg3[%49, %c0_11] : memref<128x128xf32, #tpu.memory_space<vmem>>, vector<1x128xf32>
    %51 = arith.index_cast %c3_i32 : i32 to index
    %c0_12 = arith.constant 0 : index
    %52 = vector.load %arg8[%51, %c0_12] : memref<16x128xf32, #tpu.memory_space<vmem>>, vector<1x128xf32>
    tpu.vector_store %arg8[%51, %c0_12], %50 {strides = array<i32>} : memref<16x128xf32, #tpu.memory_space<vmem>>, vector<1x128xf32>,
    %53 = arith.index_cast %48 : i32 to index
    %c0_13 = arith.constant 0 : index
    %54 = vector.load %arg5[%53, %c0_13] : memref<128x128xf32, #tpu.memory_space<vmem>>, vector<1x128xf32>
    %55 = arith.index_cast %c3_i32 : i32 to index
    %c0_14 = arith.constant 0 : index
    %56 = vector.load %arg9[%55, %c0_14] : memref<16x128xf32, #tpu.memory_space<vmem>>, vector<1x128xf32>
    tpu.vector_store %arg9[%55, %c0_14], %54 {strides = array<i32>} : memref<16x128xf32, #tpu.memory_space<vmem>>, vector<1x128xf32>,
    %c4_i32 = arith.constant 4 : i32
    %57 = arith.addi %0, %c4_i32 : i32
    %58 = arith.index_cast %57 : i32 to index
    %59 = memref.load %arg1[%58] : memref<16xi32, #tpu.memory_space<smem>>
    %60 = arith.addi %0, %c4_i32 : i32
    %61 = arith.index_cast %60 : i32 to index
    %62 = memref.load %arg2[%61] : memref<16xi32, #tpu.memory_space<smem>>
    %63 = arith.index_cast %59 : i32 to index
    %c0_15 = arith.constant 0 : index
    %64 = vector.load %arg3[%63, %c0_15] : memref<128x128xf32, #tpu.memory_space<vmem>>, vector<1x128xf32>
    %65 = arith.index_cast %c4_i32 : i32 to index
    %c0_16 = arith.constant 0 : index
    %66 = vector.load %arg8[%65, %c0_16] : memref<16x128xf32, #tpu.memory_space<vmem>>, vector<1x128xf32>
    tpu.vector_store %arg8[%65, %c0_16], %64 {strides = array<i32>} : memref<16x128xf32, #tpu.memory_space<vmem>>, vector<1x128xf32>,
    %67 = arith.index_cast %62 : i32 to index
    %c0_17 = arith.constant 0 : index
    %68 = vector.load %arg5[%67, %c0_17] : memref<128x128xf32, #tpu.memory_space<vmem>>, vector<1x128xf32>
    %69 = arith.index_cast %c4_i32 : i32 to index
    %c0_18 = arith.constant 0 : index
    %70 = vector.load %arg9[%69, %c0_18] : memref<16x128xf32, #tpu.memory_space<vmem>>, vector<1x128xf32>
    tpu.vector_store %arg9[%69, %c0_18], %68 {strides = array<i32>} : memref<16x128xf32, #tpu.memory_space<vmem>>, vector<1x128xf32>,
    %c5_i32 = arith.constant 5 : i32
    %71 = arith.addi %0, %c5_i32 : i32
    %72 = arith.index_cast %71 : i32 to index
    %73 = memref.load %arg1[%72] : memref<16xi32, #tpu.memory_space<smem>>
    %74 = arith.addi %0, %c5_i32 : i32
    %75 = arith.index_cast %74 : i32 to index
    %76 = memref.load %arg2[%75] : memref<16xi32, #tpu.memory_space<smem>>
    %77 = arith.index_cast %73 : i32 to index
    %c0_19 = arith.constant 0 : index
    %78 = vector.load %arg3[%77, %c0_19] : memref<128x128xf32, #tpu.memory_space<vmem>>, vector<1x128xf32>
    %79 = arith.index_cast %c5_i32 : i32 to index
    %c0_20 = arith.constant 0 : index
    %80 = vector.load %arg8[%79, %c0_20] : memref<16x128xf32, #tpu.memory_space<vmem>>, vector<1x128xf32>
    tpu.vector_store %arg8[%79, %c0_20], %78 {strides = array<i32>} : memref<16x128xf32, #tpu.memory_space<vmem>>, vector<1x128xf32>,
    %81 = arith.index_cast %76 : i32 to index
    %c0_21 = arith.constant 0 : index
    %82 = vector.load %arg5[%81, %c0_21] : memref<128x128xf32, #tpu.memory_space<vmem>>, vector<1x128xf32>
    %83 = arith.index_cast %c5_i32 : i32 to index
    %c0_22 = arith.constant 0 : index
    %84 = vector.load %arg9[%83, %c0_22] : memref<16x128xf32, #tpu.memory_space<vmem>>, vector<1x128xf32>
    tpu.vector_store %arg9[%83, %c0_22], %82 {strides = array<i32>} : memref<16x128xf32, #tpu.memory_space<vmem>>, vector<1x128xf32>,
    %c6_i32 = arith.constant 6 : i32
    %85 = arith.addi %0, %c6_i32 : i32
    %86 = arith.index_cast %85 : i32 to index
    %87 = memref.load %arg1[%86] : memref<16xi32, #tpu.memory_space<smem>>
    %88 = arith.addi %0, %c6_i32 : i32
    %89 = arith.index_cast %88 : i32 to index
    %90 = memref.load %arg2[%89] : memref<16xi32, #tpu.memory_space<smem>>
    %91 = arith.index_cast %87 : i32 to index
    %c0_23 = arith.constant 0 : index
    %92 = vector.load %arg3[%91, %c0_23] : memref<128x128xf32, #tpu.memory_space<vmem>>, vector<1x128xf32>
    %93 = arith.index_cast %c6_i32 : i32 to index
    %c0_24 = arith.constant 0 : index
    %94 = vector.load %arg8[%93, %c0_24] : memref<16x128xf32, #tpu.memory_space<vmem>>, vector<1x128xf32>
    tpu.vector_store %arg8[%93, %c0_24], %92 {strides = array<i32>} : memref<16x128xf32, #tpu.memory_space<vmem>>, vector<1x128xf32>,
    %95 = arith.index_cast %90 : i32 to index
    %c0_25 = arith.constant 0 : index
    %96 = vector.load %arg5[%95, %c0_25] : memref<128x128xf32, #tpu.memory_space<vmem>>, vector<1x128xf32>
    %97 = arith.index_cast %c6_i32 : i32 to index
    %c0_26 = arith.constant 0 : index
    %98 = vector.load %arg9[%97, %c0_26] : memref<16x128xf32, #tpu.memory_space<vmem>>, vector<1x128xf32>
    tpu.vector_store %arg9[%97, %c0_26], %96 {strides = array<i32>} : memref<16x128xf32, #tpu.memory_space<vmem>>, vector<1x128xf32>,
    %c7_i32 = arith.constant 7 : i32
    %99 = arith.addi %0, %c7_i32 : i32
    %100 = arith.index_cast %99 : i32 to index
    %101 = memref.load %arg1[%100] : memref<16xi32, #tpu.memory_space<smem>>
    %102 = arith.addi %0, %c7_i32 : i32
    %103 = arith.index_cast %102 : i32 to index
    %104 = memref.load %arg2[%103] : memref<16xi32, #tpu.memory_space<smem>>
    %105 = arith.index_cast %101 : i32 to index
    %c0_27 = arith.constant 0 : index
    %106 = vector.load %arg3[%105, %c0_27] : memref<128x128xf32, #tpu.memory_space<vmem>>, vector<1x128xf32>
    %107 = arith.index_cast %c7_i32 : i32 to index
    %c0_28 = arith.constant 0 : index
    %108 = vector.load %arg8[%107, %c0_28] : memref<16x128xf32, #tpu.memory_space<vmem>>, vector<1x128xf32>
    tpu.vector_store %arg8[%107, %c0_28], %106 {strides = array<i32>} : memref<16x128xf32, #tpu.memory_space<vmem>>, vector<1x128xf32>,
    %109 = arith.index_cast %104 : i32 to index
    %c0_29 = arith.constant 0 : index
    %110 = vector.load %arg5[%109, %c0_29] : memref<128x128xf32, #tpu.memory_space<vmem>>, vector<1x128xf32>
    %111 = arith.index_cast %c7_i32 : i32 to index
    %c0_30 = arith.constant 0 : index
    %112 = vector.load %arg9[%111, %c0_30] : memref<16x128xf32, #tpu.memory_space<vmem>>, vector<1x128xf32>
    tpu.vector_store %arg9[%111, %c0_30], %110 {strides = array<i32>} : memref<16x128xf32, #tpu.memory_space<vmem>>, vector<1x128xf32>,
    %c8_i32 = arith.constant 8 : i32
    %113 = arith.addi %0, %c8_i32 : i32
    %114 = arith.index_cast %113 : i32 to index
    %115 = memref.load %arg1[%114] : memref<16xi32, #tpu.memory_space<smem>>
    %116 = arith.addi %0, %c8_i32 : i32
    %117 = arith.index_cast %116 : i32 to index
    %118 = memref.load %arg2[%117] : memref<16xi32, #tpu.memory_space<smem>>
    %119 = arith.index_cast %115 : i32 to index
    %c0_31 = arith.constant 0 : index
    %120 = vector.load %arg3[%119, %c0_31] : memref<128x128xf32, #tpu.memory_space<vmem>>, vector<1x128xf32>
    %121 = arith.index_cast %c8_i32 : i32 to index
    %c0_32 = arith.constant 0 : index
    %122 = vector.load %arg8[%121, %c0_32] : memref<16x128xf32, #tpu.memory_space<vmem>>, vector<1x128xf32>
    tpu.vector_store %arg8[%121, %c0_32], %120 {strides = array<i32>} : memref<16x128xf32, #tpu.memory_space<vmem>>, vector<1x128xf32>,
    %123 = arith.index_cast %118 : i32 to index
    %c0_33 = arith.constant 0 : index
    %124 = vector.load %arg5[%123, %c0_33] : memref<128x128xf32, #tpu.memory_space<vmem>>, vector<1x128xf32>
    %125 = arith.index_cast %c8_i32 : i32 to index
    %c0_34 = arith.constant 0 : index
    %126 = vector.load %arg9[%125, %c0_34] : memref<16x128xf32, #tpu.memory_space<vmem>>, vector<1x128xf32>
    tpu.vector_store %arg9[%125, %c0_34], %124 {strides = array<i32>} : memref<16x128xf32, #tpu.memory_space<vmem>>, vector<1x128xf32>,
    %c9_i32 = arith.constant 9 : i32
    %127 = arith.addi %0, %c9_i32 : i32
    %128 = arith.index_cast %127 : i32 to index
    %129 = memref.load %arg1[%128] : memref<16xi32, #tpu.memory_space<smem>>
    %130 = arith.addi %0, %c9_i32 : i32
    %131 = arith.index_cast %130 : i32 to index
    %132 = memref.load %arg2[%131] : memref<16xi32, #tpu.memory_space<smem>>
    %133 = arith.index_cast %129 : i32 to index
    %c0_35 = arith.constant 0 : index
    %134 = vector.load %arg3[%133, %c0_35] : memref<128x128xf32, #tpu.memory_space<vmem>>, vector<1x128xf32>
    %135 = arith.index_cast %c9_i32 : i32 to index
    %c0_36 = arith.constant 0 : index
    %136 = vector.load %arg8[%135, %c0_36] : memref<16x128xf32, #tpu.memory_space<vmem>>, vector<1x128xf32>
    tpu.vector_store %arg8[%135, %c0_36], %134 {strides = array<i32>} : memref<16x128xf32, #tpu.memory_space<vmem>>, vector<1x128xf32>,
    %137 = arith.index_cast %132 : i32 to index
    %c0_37 = arith.constant 0 : index
    %138 = vector.load %arg5[%137, %c0_37] : memref<128x128xf32, #tpu.memory_space<vmem>>, vector<1x128xf32>
    %139 = arith.index_cast %c9_i32 : i32 to index
    %c0_38 = arith.constant 0 : index
    %140 = vector.load %arg9[%139, %c0_38] : memref<16x128xf32, #tpu.memory_space<vmem>>, vector<1x128xf32>
    tpu.vector_store %arg9[%139, %c0_38], %138 {strides = array<i32>} : memref<16x128xf32, #tpu.memory_space<vmem>>, vector<1x128xf32>,
    %c10_i32 = arith.constant 10 : i32
    %141 = arith.addi %0, %c10_i32 : i32
    %142 = arith.index_cast %141 : i32 to index
    %143 = memref.load %arg1[%142] : memref<16xi32, #tpu.memory_space<smem>>
    %144 = arith.addi %0, %c10_i32 : i32
    %145 = arith.index_cast %144 : i32 to index
    %146 = memref.load %arg2[%145] : memref<16xi32, #tpu.memory_space<smem>>
    %147 = arith.index_cast %143 : i32 to index
    %c0_39 = arith.constant 0 : index
    %148 = vector.load %arg3[%147, %c0_39] : memref<128x128xf32, #tpu.memory_space<vmem>>, vector<1x128xf32>
    %149 = arith.index_cast %c10_i32 : i32 to index
    %c0_40 = arith.constant 0 : index
    %150 = vector.load %arg8[%149, %c0_40] : memref<16x128xf32, #tpu.memory_space<vmem>>, vector<1x128xf32>
    tpu.vector_store %arg8[%149, %c0_40], %148 {strides = array<i32>} : memref<16x128xf32, #tpu.memory_space<vmem>>, vector<1x128xf32>,
    %151 = arith.index_cast %146 : i32 to index
    %c0_41 = arith.constant 0 : index
    %152 = vector.load %arg5[%151, %c0_41] : memref<128x128xf32, #tpu.memory_space<vmem>>, vector<1x128xf32>
    %153 = arith.index_cast %c10_i32 : i32 to index
    %c0_42 = arith.constant 0 : index
    %154 = vector.load %arg9[%153, %c0_42] : memref<16x128xf32, #tpu.memory_space<vmem>>, vector<1x128xf32>
    tpu.vector_store %arg9[%153, %c0_42], %152 {strides = array<i32>} : memref<16x128xf32, #tpu.memory_space<vmem>>, vector<1x128xf32>,
    %c11_i32 = arith.constant 11 : i32
    %155 = arith.addi %0, %c11_i32 : i32
    %156 = arith.index_cast %155 : i32 to index
    %157 = memref.load %arg1[%156] : memref<16xi32, #tpu.memory_space<smem>>
    %158 = arith.addi %0, %c11_i32 : i32
    %159 = arith.index_cast %158 : i32 to index
    %160 = memref.load %arg2[%159] : memref<16xi32, #tpu.memory_space<smem>>
    %161 = arith.index_cast %157 : i32 to index
    %c0_43 = arith.constant 0 : index
    %162 = vector.load %arg3[%161, %c0_43] : memref<128x128xf32, #tpu.memory_space<vmem>>, vector<1x128xf32>
    %163 = arith.index_cast %c11_i32 : i32 to index
    %c0_44 = arith.constant 0 : index
    %164 = vector.load %arg8[%163, %c0_44] : memref<16x128xf32, #tpu.memory_space<vmem>>, vector<1x128xf32>
    tpu.vector_store %arg8[%163, %c0_44], %162 {strides = array<i32>} : memref<16x128xf32, #tpu.memory_space<vmem>>, vector<1x128xf32>,
    %165 = arith.index_cast %160 : i32 to index
    %c0_45 = arith.constant 0 : index
    %166 = vector.load %arg5[%165, %c0_45] : memref<128x128xf32, #tpu.memory_space<vmem>>, vector<1x128xf32>
    %167 = arith.index_cast %c11_i32 : i32 to index
    %c0_46 = arith.constant 0 : index
    %168 = vector.load %arg9[%167, %c0_46] : memref<16x128xf32, #tpu.memory_space<vmem>>, vector<1x128xf32>
    tpu.vector_store %arg9[%167, %c0_46], %166 {strides = array<i32>} : memref<16x128xf32, #tpu.memory_space<vmem>>, vector<1x128xf32>,
    %c12_i32 = arith.constant 12 : i32
    %169 = arith.addi %0, %c12_i32 : i32
    %170 = arith.index_cast %169 : i32 to index
    %171 = memref.load %arg1[%170] : memref<16xi32, #tpu.memory_space<smem>>
    %172 = arith.addi %0, %c12_i32 : i32
    %173 = arith.index_cast %172 : i32 to index
    %174 = memref.load %arg2[%173] : memref<16xi32, #tpu.memory_space<smem>>
    %175 = arith.index_cast %171 : i32 to index
    %c0_47 = arith.constant 0 : index
    %176 = vector.load %arg3[%175, %c0_47] : memref<128x128xf32, #tpu.memory_space<vmem>>, vector<1x128xf32>
    %177 = arith.index_cast %c12_i32 : i32 to index
    %c0_48 = arith.constant 0 : index
    %178 = vector.load %arg8[%177, %c0_48] : memref<16x128xf32, #tpu.memory_space<vmem>>, vector<1x128xf32>
    tpu.vector_store %arg8[%177, %c0_48], %176 {strides = array<i32>} : memref<16x128xf32, #tpu.memory_space<vmem>>, vector<1x128xf32>,
    %179 = arith.index_cast %174 : i32 to index
    %c0_49 = arith.constant 0 : index
    %180 = vector.load %arg5[%179, %c0_49] : memref<128x128xf32, #tpu.memory_space<vmem>>, vector<1x128xf32>
    %181 = arith.index_cast %c12_i32 : i32 to index
    %c0_50 = arith.constant 0 : index
    %182 = vector.load %arg9[%181, %c0_50] : memref<16x128xf32, #tpu.memory_space<vmem>>, vector<1x128xf32>
    tpu.vector_store %arg9[%181, %c0_50], %180 {strides = array<i32>} : memref<16x128xf32, #tpu.memory_space<vmem>>, vector<1x128xf32>,
    %c13_i32 = arith.constant 13 : i32
    %183 = arith.addi %0, %c13_i32 : i32
    %184 = arith.index_cast %183 : i32 to index
    %185 = memref.load %arg1[%184] : memref<16xi32, #tpu.memory_space<smem>>
    %186 = arith.addi %0, %c13_i32 : i32
    %187 = arith.index_cast %186 : i32 to index
    %188 = memref.load %arg2[%187] : memref<16xi32, #tpu.memory_space<smem>>
    %189 = arith.index_cast %185 : i32 to index
    %c0_51 = arith.constant 0 : index
    %190 = vector.load %arg3[%189, %c0_51] : memref<128x128xf32, #tpu.memory_space<vmem>>, vector<1x128xf32>
    %191 = arith.index_cast %c13_i32 : i32 to index
    %c0_52 = arith.constant 0 : index
    %192 = vector.load %arg8[%191, %c0_52] : memref<16x128xf32, #tpu.memory_space<vmem>>, vector<1x128xf32>
    tpu.vector_store %arg8[%191, %c0_52], %190 {strides = array<i32>} : memref<16x128xf32, #tpu.memory_space<vmem>>, vector<1x128xf32>,
    %193 = arith.index_cast %188 : i32 to index
    %c0_53 = arith.constant 0 : index
    %194 = vector.load %arg5[%193, %c0_53] : memref<128x128xf32, #tpu.memory_space<vmem>>, vector<1x128xf32>
    %195 = arith.index_cast %c13_i32 : i32 to index
    %c0_54 = arith.constant 0 : index
    %196 = vector.load %arg9[%195, %c0_54] : memref<16x128xf32, #tpu.memory_space<vmem>>, vector<1x128xf32>
    tpu.vector_store %arg9[%195, %c0_54], %194 {strides = array<i32>} : memref<16x128xf32, #tpu.memory_space<vmem>>, vector<1x128xf32>,
    %c14_i32 = arith.constant 14 : i32
    %197 = arith.addi %0, %c14_i32 : i32
    %198 = arith.index_cast %197 : i32 to index
    %199 = memref.load %arg1[%198] : memref<16xi32, #tpu.memory_space<smem>>
    %200 = arith.addi %0, %c14_i32 : i32
    %201 = arith.index_cast %200 : i32 to index
    %202 = memref.load %arg2[%201] : memref<16xi32, #tpu.memory_space<smem>>
    %203 = arith.index_cast %199 : i32 to index
    %c0_55 = arith.constant 0 : index
    %204 = vector.load %arg3[%203, %c0_55] : memref<128x128xf32, #tpu.memory_space<vmem>>, vector<1x128xf32>
    %205 = arith.index_cast %c14_i32 : i32 to index
    %c0_56 = arith.constant 0 : index
    %206 = vector.load %arg8[%205, %c0_56] : memref<16x128xf32, #tpu.memory_space<vmem>>, vector<1x128xf32>
    tpu.vector_store %arg8[%205, %c0_56], %204 {strides = array<i32>} : memref<16x128xf32, #tpu.memory_space<vmem>>, vector<1x128xf32>,
    %207 = arith.index_cast %202 : i32 to index
    %c0_57 = arith.constant 0 : index
    %208 = vector.load %arg5[%207, %c0_57] : memref<128x128xf32, #tpu.memory_space<vmem>>, vector<1x128xf32>
    %209 = arith.index_cast %c14_i32 : i32 to index
    %c0_58 = arith.constant 0 : index
    %210 = vector.load %arg9[%209, %c0_58] : memref<16x128xf32, #tpu.memory_space<vmem>>, vector<1x128xf32>
    tpu.vector_store %arg9[%209, %c0_58], %208 {strides = array<i32>} : memref<16x128xf32, #tpu.memory_space<vmem>>, vector<1x128xf32>,
    %c15_i32 = arith.constant 15 : i32
    %211 = arith.addi %0, %c15_i32 : i32
    %212 = arith.index_cast %211 : i32 to index
    %213 = memref.load %arg1[%212] : memref<16xi32, #tpu.memory_space<smem>>
    %214 = arith.addi %0, %c15_i32 : i32
    %215 = arith.index_cast %214 : i32 to index
    %216 = memref.load %arg2[%215] : memref<16xi32, #tpu.memory_space<smem>>
    %217 = arith.index_cast %213 : i32 to index
    %c0_59 = arith.constant 0 : index
    %218 = vector.load %arg3[%217, %c0_59] : memref<128x128xf32, #tpu.memory_space<vmem>>, vector<1x128xf32>
    %219 = arith.index_cast %c15_i32 : i32 to index
    %c0_60 = arith.constant 0 : index
    %220 = vector.load %arg8[%219, %c0_60] : memref<16x128xf32, #tpu.memory_space<vmem>>, vector<1x128xf32>
    tpu.vector_store %arg8[%219, %c0_60], %218 {strides = array<i32>} : memref<16x128xf32, #tpu.memory_space<vmem>>, vector<1x128xf32>,
    %221 = arith.index_cast %216 : i32 to index
    %c0_61 = arith.constant 0 : index
    %222 = vector.load %arg5[%221, %c0_61] : memref<128x128xf32, #tpu.memory_space<vmem>>, vector<1x128xf32>
    %223 = arith.index_cast %c15_i32 : i32 to index
    %c0_62 = arith.constant 0 : index
    %224 = vector.load %arg9[%223, %c0_62] : memref<16x128xf32, #tpu.memory_space<vmem>>, vector<1x128xf32>
    tpu.vector_store %arg9[%223, %c0_62], %222 {strides = array<i32>} : memref<16x128xf32, #tpu.memory_space<vmem>>, vector<1x128xf32>,
    %c16_i32_63 = arith.constant 16 : i32
    %c0_64 = arith.constant 0 : index
    %c0_65 = arith.constant 0 : index
    %225 = vector.load %arg8[%c0_64, %c0_65] : memref<16x128xf32, #tpu.memory_space<vmem>>, vector<16x128xf32>
    %c0_66 = arith.constant 0 : index
    %c0_67 = arith.constant 0 : index
    %226 = vector.load %arg4[%c0_66, %c0_67] : memref<128x128xf32, #tpu.memory_space<vmem>>, vector<128x128xf32>
    %cst = arith.constant dense<0.000000e+00> : vector<16x128xf32>
    %227 = tpu.matmul %225, %226, %cst {dimension_numbers = #tpu.dot_dimension_numbers<[1], [0], [0], [1], [0, 0, 1, 1], [], []>} : vector<16x128xf32>, vector<128x128xf32>, vector<16x128xf32> -> vector<16x128xf32>
    %c0_68 = arith.constant 0 : index
    %c0_69 = arith.constant 0 : index
    %228 = vector.load %arg6[%c0_68, %c0_69] : memref<16x128xf32, #tpu.memory_space<vmem>>, vector<16x128xf32>
    tpu.vector_store %arg6[%c0_68, %c0_69], %227 {strides = array<i32>} : memref<16x128xf32, #tpu.memory_space<vmem>>, vector<16x128xf32>,
    %cst_70 = arith.constant dense<0xFF800000> : vector<16xf32>
    %229 = vector.multi_reduction <maximumf>, %227, %cst_70 [1] : vector<16x128xf32> to vector<16xf32>
    %230 = vector.shape_cast %229 : vector<16xf32> to vector<16x1xf32>
    %231 = vector.broadcast %230 : vector<16x1xf32> to vector<16x128xf32>
    %232 = arith.subf %227, %231 : vector<16x128xf32>
    %233 = math.exp %232 : vector<16x128xf32>
    %cst_71 = arith.constant dense<0.000000e+00> : vector<16xf32>
    %234 = vector.multi_reduction <add>, %233, %cst_71 [1] : vector<16x128xf32> to vector<16xf32>
    %235 = vector.shape_cast %234 : vector<16xf32> to vector<16x1xf32>
    %236 = math.log %235 : vector<16x1xf32>
    %237 = arith.addf %230, %236 : vector<16x1xf32>
    %c0_72 = arith.constant 0 : index
    %c0_73 = arith.constant 0 : index
    %238 = vector.load %arg9[%c0_72, %c0_73] : memref<16x128xf32, #tpu.memory_space<vmem>>, vector<16x128xf32>
    %239 = arith.mulf %225, %238 : vector<16x128xf32>
    %cst_74 = arith.constant dense<0.000000e+00> : vector<16xf32>
    %240 = vector.multi_reduction <add>, %239, %cst_74 [1] : vector<16x128xf32> to vector<16xf32>
    %241 = vector.shape_cast %240 : vector<16xf32> to vector<16x1xf32>
    %242 = arith.subf %237, %241 : vector<16x1xf32>
    %c0_75 = arith.constant 0 : index
    %c0_76 = arith.constant 0 : index
    %243 = vector.load %arg7[%c0_75, %c0_76] : memref<16x1xf32, #tpu.memory_space<vmem>>, vector<16x1xf32>
    tpu.vector_store %arg7[%c0_75, %c0_76], %242 {strides = array<i32>} : memref<16x1xf32, #tpu.memory_space<vmem>>, vector<16x1xf32>,
    return
  }
  func.func @transform_0(%arg0: i32, %arg1: memref<16xi32, #tpu.memory_space<smem>>, %arg2: memref<16xi32, #tpu.memory_space<smem>>) -> (i32, i32) {
    %c0_i32 = arith.constant 0 : i32
    %c0_i32_0 = arith.constant 0 : i32
    %c0_i32_1 = arith.constant 0 : i32
    return %c0_i32, %c0_i32_0 : i32, i32
  }
  func.func @transform_1(%arg0: i32, %arg1: memref<16xi32, #tpu.memory_space<smem>>, %arg2: memref<16xi32, #tpu.memory_space<smem>>) -> (i32, i32) {
    %c0_i32 = arith.constant 0 : i32
    %c0_i32_0 = arith.constant 0 : i32
    %c0_i32_1 = arith.constant 0 : i32
    return %c0_i32, %c0_i32_0 : i32, i32
  }
  func.func @transform_2(%arg0: i32, %arg1: memref<16xi32, #tpu.memory_space<smem>>, %arg2: memref<16xi32, #tpu.memory_space<smem>>) -> (i32, i32) {
    %c0_i32 = arith.constant 0 : i32
    %c0_i32_0 = arith.constant 0 : i32
    %c0_i32_1 = arith.constant 0 : i32
    return %c0_i32, %c0_i32_0 : i32, i32
  }
  func.func @transform_3(%arg0: i32, %arg1: memref<16xi32, #tpu.memory_space<smem>>, %arg2: memref<16xi32, #tpu.memory_space<smem>>) -> (i32, i32) {
    %c0_i32 = arith.constant 0 : i32
    %c0_i32_0 = arith.constant 0 : i32
    return %arg0, %c0_i32 : i32, i32
  }
  func.func @transform_4(%arg0: i32, %arg1: memref<16xi32, #tpu.memory_space<smem>>, %arg2: memref<16xi32, #tpu.memory_space<smem>>) -> (i32, i32) {
    %c0_i32 = arith.constant 0 : i32
    %c0_i32_0 = arith.constant 0 : i32
    return %arg0, %c0_i32 : i32, i32
  }
}

</mosaic_0001>

<bundles_post_ra>
// kernel: _forward_with_loss.1
= control target key start
LH: loop header
LB: loop body
LE: loop exit
PB: predicated region body
PF: predicated region fallthrough
CT: control target
= control target key end

     0   :  { %s802_s0 = inlined_call_operand.vmem [shape: s32[16], index: 0, kind: input, shape index: {}]   ;;  %s803_s2 = inlined_call_operand.vmem [shape: f32[128,128], index: 2, kind: input, shape index: {}]   ;;  %s804_s3 = inlined_call_operand.vmem [shape: f32[128,128], index: 3, kind: input, shape index: {}]   ;;  %s805_s4 = inlined_call_operand.vmem [shape: f32[128,128], index: 4, kind: input, shape index: {}]   ;;  %s806_s5 = inlined_call_operand.hbm [shape: f32[16,128], index: 5, kind: output, shape index: {0}]   ;;  %s807_s6 = inlined_call_operand.vmem [shape: f32[16,1], index: 6, kind: output, shape index: {1}]   ;;  %s808_s1 = inlined_call_operand.vmem [shape: s32[16], index: 1, kind: input, shape index: {}]  }
   0x1   :  { %s12_s23 = sshll.u32 %s802_s0, 4  ;;  %s16_s26 = sshll.u32 %s808_s1, 4  ;;  %s13_s23 = int_to_ptr.vmem [resolvable:$true] %s12_s23  ;;  %s17_s26 = int_to_ptr.vmem [resolvable:$true] %s16_s26 }
   0x2   :  { %s481_s27 = scalar_lea.vmem %s13_s23, 16  ;;  %p486_p1 = scmp.lt.s32.totalorder %s13_s23, %s13_s23 }
   0x3   :  { %p482_p0 = scmp.ne.s32.totalorder %s13_s23, %s481_s27  ;;  %p487_p2 = scmp.lt.s32.totalorder %s481_s27, %s481_s27 }
   0x5   :  { %p488_p3 = por %p487_p2, %p486_p1 }
   0x7   :  { %p489_p4 = pnand %p488_p3, %p482_p0 }
   0x9   :  { %492 = shalt.err (!%p489_p4)  }
   0xa   :  { %s531_s28 = smov [#allocation5]   ;;  %s493_s29 = scalar_lea.vmem %s17_s26, 16 }
   0xb   :  { %15 = dma.vmem_to_smem %s13_s23, 16, %s531_s28, [#allocation4] }
   0xc   :  { %p494_p5 = scmp.ne.s32.totalorder %s17_s26, %s493_s29  ;;  %p498_p6 = scmp.lt.s32.totalorder %s17_s26, %s17_s26 }
   0xd   :  { %p499_p7 = scmp.lt.s32.totalorder %s493_s29, %s493_s29 }
   0xf   :  { %p500_p8 = por %p499_p7, %p498_p6 }
  0x11   :  { %p501_p9 = pnand %p500_p8, %p494_p5 }
  0x13   :  { %504 = shalt.err (!%p501_p9)  }
  0x14   :  { %s532_s0 = smov [#allocation6]  }
  0x15   :  { %19 = dma.vmem_to_smem %s17_s26, 16, %s532_s0, [#allocation4] }
  0x16   :  { %527 = dma.done.wait [#allocation4], 32 }
  0x17   :  { %528 = vsyncadd [#allocation4], 4294967264 }
  0x18   :  { %21 = sfence }
  0x19   :  { %v175_v0 = vld [vmem:[%s804_s3] sm:$0xff]  ;;  %v176_v1 = vld [vmem:[%s804_s3 + $0x8] sm:$0xff]  ;;  %v177_v2 = vld [vmem:[%s804_s3 + $0x10] sm:$0xff]  ;;  %s30_s11 = sld [smem:[#allocation5]]  ;;  %s353_s14 = sld [smem:[#allocation5 + $0x1]] }
  0x1a   :  { %v436_v3 = vpack.c.bf16 %v176_v1, %v175_v0  ;;  %v178_v4 = vld [vmem:[%s804_s3 + $0x18] sm:$0xff]  ;;  %v179_v6 = vld [vmem:[%s804_s3 + $0x20] sm:$0xff]  ;;  %v180_v7 = vld [vmem:[%s804_s3 + $0x28] sm:$0xff]  ;;  %s355_s19 = sld [smem:[#allocation5 + $0x2]]  ;;  %s595_s20 = sld [smem:[#allocation5 + $0x3]] }
  0x1b   :  { %v440_v5 = vpack.c.bf16 %v178_v4, %v177_v2  ;;  %s597_s21 = sld [smem:[#allocation5 + $0x4]]  ;;  %v444_v8 = vpack.c.bf16 %v180_v7, %v179_v6  ;;  %s599_s22 = sld [smem:[#allocation5 + $0x5]]  ;;  %v181_v9 = vld [vmem:[%s804_s3 + $0x30] sm:$0xff]  ;;  %v182_v10 = vld [vmem:[%s804_s3 + $0x38] sm:$0xff] }
  0x1c   :  { %437 = vmatprep.subr.bf16.mxu0 %v436_v3  ;;  %s601_s23 = sld [smem:[#allocation5 + $0x6]]  ;;  %s612_s1 = sld [smem:[#allocation5 + $0x7]] }
  0x1d   :  { %439 = vmatpush3.bf16.msra.mxu0 %v436_v3 }
  0x1e   :  { %441 = vmatprep.subr.bf16.mxu0 %v440_v5 }
  0x1f   :  { %s32_s0 = scalar_lea.vmem %s803_s2, %s30_s11 }
  0x20   :  { %22 = vsyncpa [#allocation8], 0  ;;  %v33_v11 = vld [vmem:[%s32_s0] sm:$0x1]  ;;  %s41_s8 = scalar_lea.vmem %s803_s2, %s353_s14  ;;  %s617_s9 = sld [smem:[#allocation5 + $0x8]]  ;;  %v448_v13 = vpack.c.bf16 %v182_v10, %v181_v9  ;;  %v184_v16 = vld [vmem:[%s804_s3 + $0x48] sm:$0xff] }
  0x21   :  { %443 = vmatpush3.bf16.msra.mxu0 %v440_v5  ;;  %34 = vst [vmem:[#allocation2] sm:$0x1] %v33_v11  ;;  %v42_v12 = vld [vmem:[%s41_s8] sm:$0x1]  ;;  %s50_s13 = scalar_lea.vmem %s803_s2, %s355_s19  ;;  %s622_s11 = sld [smem:[#allocation5 + $0x9]]  ;;  %v185_v23 = vld [vmem:[%s804_s3 + $0x50] sm:$0xff] }
  0x22   :  { %445 = vmatprep.subr.bf16.mxu0 %v444_v8  ;;  %43 = vst [vmem:[#allocation2 + $0x1] sm:$0x1] %v42_v12  ;;  %v51_v14 = vld [vmem:[%s50_s13] sm:$0x1]  ;;  %s59_s16 = scalar_lea.vmem %s803_s2, %s595_s20  ;;  %s628_s17 = sld [smem:[#allocation5 + $0xa]]  ;;  %v186_v24 = vld [vmem:[%s804_s3 + $0x58] sm:$0xff] }
  0x23   :  { %v183_v15 = vld [vmem:[%s804_s3 + $0x40] sm:$0xff]  ;;  %52 = vst [vmem:[#allocation2 + $0x2] sm:$0x1] %v51_v14  ;;  %s68_s28 = scalar_lea.vmem %s803_s2, %s597_s21  ;;  %s640_s29 = sld [smem:[#allocation5 + $0xb]]  ;;  %v456_v28 = vpack.c.bf16 %v186_v24, %v185_v23  ;;  %v188_v31 = vld [vmem:[%s804_s3 + $0x68] sm:$0xff]  ;;  %v189_v37 = vld [vmem:[%s804_s3 + $0x70] sm:$0xff] }
  0x24   :  { %v60_v17 = vld [vmem:[%s59_s16] sm:$0x1]  ;;  %s77_s30 = scalar_lea.vmem %s803_s2, %s599_s22  ;;  %s86_s10 = scalar_lea.vmem %s803_s2, %s601_s23  ;;  %v452_v21 = vpack.c.bf16 %v184_v16, %v183_v15  ;;  %v190_v38 = vld [vmem:[%s804_s3 + $0x78] sm:$0xff] }
  0x25   :  { %61 = vst [vmem:[#allocation2 + $0x3] sm:$0x1] %v60_v17  ;;  %v69_v18 = vld [vmem:[%s68_s28] sm:$0x1]  ;;  %447 = vmatpush3.bf16.msra.mxu0 %v444_v8  ;;  %s95_s13 = scalar_lea.vmem %s803_s2, %s612_s1  ;;  %s654_s15 = sld [smem:[#allocation5 + $0xc]]  ;;  %v464_v40 = vpack.c.bf16 %v190_v38, %v189_v37 }
  0x26   :  { %70 = vst [vmem:[#allocation2 + $0x4] sm:$0x1] %v69_v18  ;;  %v78_v19 = vld [vmem:[%s77_s30] sm:$0x1]  ;;  %449 = vmatprep.subr.bf16.mxu0 %v448_v13  ;;  %s104_s23 = scalar_lea.vmem %s803_s2, %s617_s9  ;;  %s377_s16 = sld [smem:[#allocation5 + $0xd]] }
  0x27   :  { %v87_v20 = vld [vmem:[%s86_s10] sm:$0x1]  ;;  %79 = vst [vmem:[#allocation2 + $0x5] sm:$0x1] %v78_v19  ;;  %s113_s27 = scalar_lea.vmem %s803_s2, %s622_s11  ;;  %s379_s28 = sld [smem:[#allocation5 + $0xe]] }
  0x28   :  { %88 = vst [vmem:[#allocation2 + $0x6] sm:$0x1] %v87_v20  ;;  %v96_v22 = vld [vmem:[%s95_s13] sm:$0x1]  ;;  %s122_s0 = scalar_lea.vmem %s803_s2, %s628_s17  ;;  %s674_s30 = sld [smem:[#allocation5 + $0xf]] }
  0x29   :  { %97 = vst [vmem:[#allocation2 + $0x7] sm:$0x1] %v96_v22  ;;  %v105_v25 = vld [vmem:[%s104_s23] sm:$0x1]  ;;  %451 = vmatpush3.bf16.msra.mxu0 %v448_v13  ;;  %s131_s10 = scalar_lea.vmem %s803_s2, %s640_s29  ;;  %s362_s7 = sld [smem:[#allocation6 + $0x5]] }
  0x2a   :  { %106 = vst [vmem:[#allocation2 + $0x8] sm:$0x1] %v105_v25  ;;  %v114_v26 = vld [vmem:[%s113_s27] sm:$0x1]  ;;  %453 = vmatprep.subr.bf16.mxu0 %v452_v21  ;;  %s364_s8 = sld [smem:[#allocation6 + $0x6]]  ;;  %s720_s11 = sld [smem:[#allocation6 + $0x8]] }
  0x2b   :  { %115 = vst [vmem:[#allocation2 + $0x9] sm:$0x1] %v114_v26  ;;  %v123_v27 = vld [vmem:[%s122_s0] sm:$0x1]  ;;  %s140_s14 = scalar_lea.vmem %s803_s2, %s654_s15  ;;  %s358_s0 = sld [smem:[#allocation6 + $0x3]] }
  0x2c   :  { %124 = vst [vmem:[#allocation2 + $0xa] sm:$0x1] %v123_v27  ;;  %v132_v29 = vld [vmem:[%s131_s10] sm:$0x1]  ;;  %s149_s18 = scalar_lea.vmem %s803_s2, %s377_s16  ;;  %s366_s10 = sld [smem:[#allocation6 + $0x7]] }
  0x2d   :  { %v187_v30 = vld [vmem:[%s804_s3 + $0x60] sm:$0xff]  ;;  %133 = vst [vmem:[#allocation2 + $0xb] sm:$0x1] %v132_v29  ;;  %455 = vmatpush3.bf16.msra.mxu0 %v452_v21  ;;  %s158_s1 = scalar_lea.vmem %s803_s2, %s379_s28  ;;  %s354_s3 = sld [smem:[#allocation6 + $0x1]] }
  0x2e   :  { %v141_v32 = vld [vmem:[%s140_s14] sm:$0x1]  ;;  %457 = vmatprep.subr.bf16.mxu0 %v456_v28  ;;  %v460_v34 = vpack.c.bf16 %v188_v31, %v187_v30  ;;  %s167_s26 = scalar_lea.vmem %s803_s2, %s674_s30  ;;  %s31_s2 = sld [smem:[#allocation6]] }
  0x2f   :  { %142 = vst [vmem:[#allocation2 + $0xc] sm:$0x1] %v141_v32  ;;  %v150_v33 = vld [vmem:[%s149_s18] sm:$0x1]  ;;  %s356_s28 = sld [smem:[#allocation6 + $0x2]]  ;;  %s360_s30 = sld [smem:[#allocation6 + $0x4]] }
  0x30   :  { %v696_v35 = vld [vmem:[#allocation2] sm:$0xff]  ;;  %151 = vst [vmem:[#allocation2 + $0xd] sm:$0x1] %v150_v33  ;;  %s722_s12 = sld [smem:[#allocation6 + $0x9]]  ;;  %s724_s21 = sld [smem:[#allocation6 + $0xa]] }
  0x31   :  { %v159_v36 = vld [vmem:[%s158_s1] sm:$0x1]  ;;  %433 = vmatprep.mubr.f32.mxu0 %v696_v35  ;;  %459 = vmatpush3.bf16.msra.mxu0 %v456_v28  ;;  %s726_s17 = sld [smem:[#allocation6 + $0xb]]  ;;  %s89_s13 = scalar_lea.vmem %s805_s4, %s364_s8 }
  0x32   :  { %160 = vst [vmem:[#allocation2 + $0xe] sm:$0x1] %v159_v36  ;;  %v168_v39 = vld [vmem:[%s167_s26] sm:$0x1]  ;;  %461 = vmatprep.subr.bf16.mxu0 %v460_v34  ;;  %s62_s26 = scalar_lea.vmem %s805_s4, %s358_s0  ;;  %s98_s29 = scalar_lea.vmem %s805_s4, %s366_s10 }
  0x33   :  { %169 = vst [vmem:[#allocation2 + $0xf] sm:$0x1] %v168_v39  ;;  %s44_s18 = scalar_lea.vmem %s805_s4, %s354_s3  ;;  %v63_v47 = vld [vmem:[%s62_s26] sm:$0x1]  ;;  %s80_s3 = scalar_lea.vmem %s805_s4, %s362_s7 }
  0x34   :  { %s35_s14 = scalar_lea.vmem %s805_s4, %s31_s2  ;;  %v45_v45 = vld [vmem:[%s44_s18] sm:$0x1]  ;;  %64 = vst [vmem:[#allocation3 + $0x3] sm:$0x1] %v63_v47  ;;  %s107_s23 = scalar_lea.vmem %s805_s4, %s720_s11 }
  0x35   :  { %463 = vmatpush3.bf16.msra.mxu0 %v460_v34  ;;  %v36_v44 = vld [vmem:[%s35_s14] sm:$0x1]  ;;  %s53_s1 = scalar_lea.vmem %s805_s4, %s356_s28  ;;  %46 = vst [vmem:[#allocation3 + $0x1] sm:$0x1] %v45_v45  ;;  %s71_s16 = scalar_lea.vmem %s805_s4, %s360_s30 }
  0x36   :  { %465 = vmatprep.subr.bf16.mxu0 %v464_v40  ;;  %37 = vst [vmem:[#allocation3] sm:$0x1] %v36_v44  ;;  %v54_v46 = vld [vmem:[%s53_s1] sm:$0x1]  ;;  %s116_s19 = scalar_lea.vmem %s805_s4, %s722_s12  ;;  %s125_s10 = scalar_lea.vmem %s805_s4, %s724_s21 }
  0x37   :  { %55 = vst [vmem:[#allocation3 + $0x2] sm:$0x1] %v54_v46  ;;  %v72_v48 = vld [vmem:[%s71_s16] sm:$0x1]  ;;  %s134_s26 = scalar_lea.vmem %s805_s4, %s726_s17  ;;  %s376_s11 = sld [smem:[#allocation6 + $0xc]] }
  0x38   :  { %v81_v49 = vld [vmem:[%s80_s3] sm:$0x1]  ;;  %73 = vst [vmem:[#allocation3 + $0x4] sm:$0x1] %v72_v48  ;;  %s378_s12 = sld [smem:[#allocation6 + $0xd]]  ;;  %s380_s27 = sld [smem:[#allocation6 + $0xe]] }
  0x39   :  { %467 = vmatpush3.bf16.msra.mxu0 %v464_v40  ;;  %82 = vst [vmem:[#allocation3 + $0x5] sm:$0x1] %v81_v49  ;;  %v90_v50 = vld [vmem:[%s89_s13] sm:$0x1]  ;;  %s382_s9 = sld [smem:[#allocation6 + $0xf]] }
  0x3a   :  { %v709_v41 = vld [vmem:[#allocation2 + $0x8] sm:$0xff]  ;;  %v99_v51 = vld [vmem:[%s98_s29] sm:$0x1]  ;;  %91 = vst [vmem:[#allocation3 + $0x6] sm:$0x1] %v90_v50 }
  0x3b   :  { %100 = vst [vmem:[#allocation3 + $0x7] sm:$0x1] %v99_v51  ;;  %v108_v52 = vld [vmem:[%s107_s23] sm:$0x1] }
  0x3c   :  { %434 = vmatmul.mubr.f32.vlgmr.msra.gmra.mrb[0].mxu0 %v709_v41  ;;  %v117_v53 = vld [vmem:[%s116_s19] sm:$0x1]  ;;  %109 = vst [vmem:[#allocation3 + $0x8] sm:$0x1] %v108_v52 }
  0x3d   :  { %118 = vst [vmem:[#allocation3 + $0x9] sm:$0x1] %v117_v53  ;;  %v126_v54 = vld [vmem:[%s125_s10] sm:$0x1]  ;;  %s143_s2 = scalar_lea.vmem %s805_s4, %s376_s11 }
  0x3e   :  { %v135_v55 = vld [vmem:[%s134_s26] sm:$0x1]  ;;  %127 = vst [vmem:[#allocation3 + $0xa] sm:$0x1] %v126_v54  ;;  %s152_s3 = scalar_lea.vmem %s805_s4, %s378_s12  ;;  %s161_s13 = scalar_lea.vmem %s805_s4, %s380_s27 }
  0x3f   :  { %136 = vst [vmem:[#allocation3 + $0xb] sm:$0x1] %v135_v55  ;;  %v144_v58 = vld [vmem:[%s143_s2] sm:$0x1]  ;;  %s170_s29 = scalar_lea.vmem %s805_s4, %s382_s9  ;;  %s533_s4 = smov [#allocation7]  }
  0x40   :  { %145 = vst [vmem:[#allocation3 + $0xc] sm:$0x1] %v144_v58  ;;  %v153_v59 = vld [vmem:[%s152_s3] sm:$0x1]  ;;  %s306_s30 = sshll.u32 %s533_s4, 4  ;;  %s307_s30 = int_to_ptr.vmem [resolvable:$true] %s306_s30 }
  0x41   :  { %v162_v60 = vld [vmem:[%s161_s13] sm:$0x1]  ;;  %154 = vst [vmem:[#allocation3 + $0xd] sm:$0x1] %v153_v59  ;;  %s505_s7 = scalar_lea.vmem %s307_s30, 256  ;;  %p510_p11 = scmp.lt.s32.totalorder %s307_s30, %s307_s30 }
  0x42   :  { %v288_v56 = vld [vmem:[#allocation3] sm:$0xff]  ;;  %163 = vst [vmem:[#allocation3 + $0xe] sm:$0x1] %v162_v60  ;;  %v171_v61 = vld [vmem:[%s170_s29] sm:$0x1]  ;;  %p506_p10 = scmp.ne.s32.totalorder %s307_s30, %s505_s7  ;;  %p511_p12 = scmp.lt.s32.totalorder %s505_s7, %s505_s7 }
  0x43   :  { %v290_v57 = vmul.f32 %v288_v56, %v696_v35  ;;  %172 = vst [vmem:[#allocation3 + $0xf] sm:$0x1] %v171_v61 }
  0x44   :  { %p512_p13 = por %p511_p12, %p510_p11 }
  0x46   :  { %p513_p0 = pnand %p512_p13, %p506_p10 }
  0x4a   :  { %v289_v5 = vld [vmem:[#allocation3 + $0x8] sm:$0xff] }
  0x4b   :  { %v291_v7 = vmul.f32 %v289_v5, %v709_v41 }
 0x10f   :  { %v712_v42 = vpop.f32.mrb[0].mxu0 }
 0x110   :  { %267 = vst [vmem:[#allocation7 + $0x8] sm:$0xff] %v712_v42  ;;  %v715_v43 = vpop.f32.mrb[1].mxu0 }
 0x111   :  { %266 = vst [vmem:[#allocation7] sm:$0xff] %v715_v43  ;;  %268 = vmax.xlane.f32.xlu0 %v715_v43 }
 0x115   :  { %270 = vmax.xlane.f32.xlu0 %v712_v42 }
 0x119   :  { %292 = vadd.xlane.f32.xlu0 %v290_v57 }
 0x19e   :  { %v269_v62 = vpop.xlane.xlu0 %268 }
 0x19f   :  { %v272_v63 = vsub.f32 %v715_v43, %v269_v62 }
 0x1a1   :  { %v274_v0 = vmul.f32 1.442695, %v272_v63 }
 0x1a2   :  { %v271_v1 = vpop.xlane.xlu0 %270 }
 0x1a3   :  { %v273_v2 = vsub.f32 %v712_v42, %v271_v1  ;;  %473 = vpow2.f32 %v274_v0 }
 0x1a5   :  { %v276_v3 = vmul.f32 1.442695, %v273_v2 }
 0x1a7   :  { %475 = vpow2.f32 %v276_v3 }
 0x1ad   :  { %v474_v4 = vpop.eup %473 }
 0x1ae   :  { %278 = vadd.xlane.f32.xlu1 %v474_v4 }
 0x1b1   :  { %v476_v6 = vpop.eup %475 }
 0x1b2   :  { %280 = vadd.xlane.f32.xlu1 %v476_v6 }
 0x1b6   :  { %294 = vadd.xlane.f32.xlu1 %v291_v7 }
 0x1b7   :  { %516 = shalt.err (!%p513_p0)
}
 0x1b8   :  { %s517_s24 = scalar_lea.hbm %s806_s5, 256 }
 0x1b9   :  { %p518_p1 = scmp.ne.s32.totalorder %s806_s5, %s517_s24  ;;  %p521_p2 = scmp.lt.u32.totalorder %s517_s24, %s806_s5 }
 0x1bb   :  { %p523_p3 = pnand %p521_p2, %p518_p1 }
 0x1bd   :  { %526 = shalt.err (!%p523_p3)
}
 0x1be   :  { %s534_s25 = smov 128   ;;  %s535_s15 = smov 8   ;;  %v293_v12 = vpop.xlane.xlu0 %292  ;;  %vm298_vm0 = vcmask 7168  }
 0x1bf   :  { %312 = dma.vmem_to_hbm [thread:$0]  %s307_s30, 256, %s806_s5, [#allocation8], %s534_s25, %s534_s25, %s535_s15  }
 0x23b   :  { %v279_v8 = vpop.xlane.xlu1 %278 }
 0x23c   :  { %477 = vlog2.f32 %v279_v8 }
 0x23f   :  { %v281_v9 = vpop.xlane.xlu1 %280 }
 0x240   :  { %479 = vlog2.f32 %v281_v9 }
 0x243   :  { %v295_v17 = vpop.xlane.xlu1 %294 }
 0x246   :  { %v478_v10 = vpop.eup %477 }
 0x247   :  { %v283_v11 = vmul.f32 0.6931472, %v478_v10 }
 0x249   :  { %v286_v13 = vadd.f32 %v283_v11, %v269_v62 }
 0x24a   :  { %v480_v14 = vpop.eup %479 }
 0x24b   :  { %v285_v15 = vmul.f32 0.6931472, %v480_v14  ;;  %v296_v16 = vsub.f32 %v286_v13, %v293_v12 }
 0x24d   :  { %299 = vst.msk [vmem:[%s807_s6] sm:$0xff] %vm298_vm0, %v296_v16  ;;  %v287_v18 = vadd.f32 %v285_v15, %v271_v1 }
 0x24f   :  { %v297_v19 = vsub.f32 %v287_v18, %v295_v17 }
 0x251   :  { %300 = vst.msk [vmem:[%s807_s6 + $0x8] sm:$0xff] %vm298_vm0, %v297_v19 }
 0x252   :  { %529 = dma.done.wait [#allocation8], 256  }
 0x253   :  { %530 = vsyncadd [#allocation8], 4294967040 }
 0x254   :  { %320 = vsyncpa [#allocation8], 1 }

</bundles_post_ra>
